<compile_context>
chip_gen: v5e
topology: v5e:2x2
jax: 0.10.0
libtpu: 0.0.40
codegen_flags: <defaults>
</compile_context>

<pallas_src>
import jax
import jax.numpy as jnp
from jax import lax
from jax.experimental import pallas as pl
from jax.experimental.pallas import tpu as pltpu

_MIB = 1024 * 1024
# Conservative working-set budget: double-buffered x/W/out blocks + f32 accumulator.
# Fits v7x's 64 MiB per-TensorCore VMEM with headroom; trivially fits v5e/v6e (128 MiB).
_VMEM_BUDGET = 40 * _MIB
_VMEM_LIMIT_CAP = 48 * _MIB


def _round_up(x, m):
    return ((x + m - 1) // m) * m


def _sublane(dtype):
    # Native sublane multiple: 8 for 32-bit, 16 for 16-bit, 32 for 8-bit dtypes.
    return max(8, 32 // jnp.dtype(dtype).itemsize)


def _pick_m_tile(m, preferred, sublane):
    """Balanced M tile: minimizes row padding instead of rounding M up to the tile."""
    if m <= preferred:
        return _round_up(m, sublane)
    n_blocks = pl.cdiv(m, preferred)
    return _round_up(pl.cdiv(m, n_blocks), sublane)


def _pick_nk_tile(dim, preferred, align=128):
    """Lane-aligned tile for N / K that, when possible, exactly divides the
    128-aligned dim so the wrapper never has to jnp.pad that operand axis."""
    dim_aligned = _round_up(dim, align)
    if dim_aligned <= preferred:
        return dim_aligned
    cand = preferred
    while cand >= max(align, preferred // 2):
        if dim_aligned % cand == 0:
            return cand
        cand -= align
    return preferred


def _pad_to(a, target_shape):
    pads = [(0, t - s) for s, t in zip(a.shape, target_shape)]
    if all(p == (0, 0) for p in pads):
        return a
    return jnp.pad(a, pads)


# ----------------------------------------------------------------------------- kernels
def _linear_kernel_single_k(x_ref, w_ref, b_ref, o_ref):
    # Whole K fits in one block: skip the VMEM accumulator round trip entirely.
    acc = lax.dot_general(
        x_ref[...], w_ref[...],
        dimension_numbers=(((1,), (1,)), ((), ())),   # contract K of x with K of W(N,K)
        preferred_element_type=jnp.float32,
    )
    o_ref[...] = (acc + b_ref[...].astype(jnp.float32)).astype(o_ref.dtype)


def _linear_kernel_multi_k(x_ref, w_ref, b_ref, o_ref, acc_ref):
    # x_ref: (tm, tk)   w_ref: (tn, tk)   b_ref: (1, tn)   o_ref: (tm, tn)
    # acc_ref: (tm, tn) f32 VMEM scratch, resident across the K grid axis.
    k = pl.program_id(2)

    @pl.when(k == 0)
    def _():
        acc_ref[...] = jnp.zeros_like(acc_ref)

    acc_ref[...] += lax.dot_general(
        x_ref[...], w_ref[...],
        dimension_numbers=(((1,), (1,)), ((), ())),
        preferred_element_type=jnp.float32,
    )

    @pl.when(k == pl.num_programs(2) - 1)
    def _():
        # Bias added exactly once, on the f32 accumulator, in the finalize step.
        o_ref[...] = (acc_ref[...] + b_ref[...].astype(jnp.float32)).astype(o_ref.dtype)


# ----------------------------------------------------------------------------- wrapper
def prepare_base_linear_params(weight, bias=None, compute_dtype=jnp.bfloat16):
    """One-time prep of the frozen base-layer params (cast to the MXU compute dtype).

    Call once at adapter init so the per-forward wrapper performs no weight HBM copies.
    """
    w = weight.astype(compute_dtype)
    b = None if bias is None else bias.astype(jnp.float32)
    return w, b


def base_adapter_forward(x, weight, bias=None, *,
                         compute_dtype=jnp.bfloat16,
                         tile_m=None, tile_n=None, tile_k=None):
    """Pallas equivalent of Base_Adapter.forward(x) with base_layer = nn.Linear.

    x:      (..., in_features)
    weight: (out_features, in_features)  -- PyTorch nn.Linear convention (NOT transposed)
    bias:   (out_features,) or None
    returns (..., out_features) in x.dtype
    """
    lead_shape = x.shape[:-1]
    K = x.shape[-1]
    N = weight.shape[0]
    out_dtype = x.dtype

    x2d = x.reshape(-1, K)
    M = x2d.shape[0]

    # --- operand dtypes (MXU prefers <=16-bit operands; accumulation stays f32) -----
    if x2d.dtype != compute_dtype:
        x2d = x2d.astype(compute_dtype)
    w = weight if weight.dtype == compute_dtype else weight.astype(compute_dtype)
    if bias is None:
        b = jnp.zeros((N,), jnp.float32)
    else:
        b = bias if bias.dtype == jnp.float32 else bias.astype(jnp.float32)

    x_bytes = jnp.dtype(compute_dtype).itemsize
    o_bytes = jnp.dtype(out_dtype).itemsize
    sub = max(_sublane(compute_dtype), _sublane(out_dtype))

    # --- tile selection --------------------------------------------------------------
    wide_operands = x_bytes >= 4            # f32 compute path
    skinny_m = M <= 256                     # decode / per-token: weight-bandwidth bound
    if skinny_m:
        pref_m, pref_n, pref_k = 256, 1024, (1024 if wide_operands else 2048)
    else:
        pref_m, pref_n, pref_k = 512, 512, (512 if wide_operands else 1024)

    tm = tile_m if tile_m is not None else _pick_m_tile(M, pref_m, sub)
    tn = tile_n if tile_n is not None else _pick_nk_tile(N, pref_n)
    tk = tile_k if tile_k is not None else _pick_nk_tile(K, pref_k)

    def footprint(tm_, tn_, tk_):
        # 2x-buffered x / W / out blocks + bias block (+ f32 accumulator if multi-K).
        f = 2 * (tm_ * tk_ * x_bytes + tn_ * tk_ * x_bytes + tm_ * tn_ * o_bytes + tn_ * 4)
        if pl.cdiv(K, tk_) > 1:
            f += tm_ * tn_ * 4
        return f

    # Keep the working set inside the per-core VMEM budget (defensive; defaults fit).
    while footprint(tm, tn, tk) > _VMEM_BUDGET:
        if tk >= tn and tk > 128:
            tk = max(128, (tk // 2) // 128 * 128)
        elif tn > 128:
            tn = max(128, (tn // 2) // 128 * 128)
        else:
            break

    num_m, num_n, num_k = pl.cdiv(M, tm), pl.cdiv(N, tn), pl.cdiv(K, tk)
    Mp, Np, Kp = num_m * tm, num_n * tn, num_k * tk

    # Pad only genuinely ragged dims (no-op for typical 128-multiple hidden sizes).
    x_p = _pad_to(x2d, (Mp, Kp))
    w_p = _pad_to(w, (Np, Kp))
    b_p = _pad_to(b.reshape(1, N), (1, Np))

    vmem_limit = int(min(_VMEM_LIMIT_CAP, max(32 * _MIB, int(footprint(tm, tn, tk) * 1.5))))
    cost = pl.CostEstimate(
        flops=2 * Mp * Np * Kp,
        transcendentals=0,
        bytes_accessed=int(Mp * Kp * x_bytes * num_n + Np * Kp * x_bytes * num_m
                           + Mp * Np * o_bytes),
    )

    if num_k == 1:
        # Fast path for small adapter base layers: no accumulator, 2-D grid.
        y_p = pl.pallas_call(
            _linear_kernel_single_k,
            out_shape=jax.ShapeDtypeStruct((Mp, Np), out_dtype),
            grid_spec=pltpu.PrefetchScalarGridSpec(
                num_scalar_prefetch=0,
                grid=(num_m, num_n),
                in_specs=[
                    pl.BlockSpec((tm, Kp), lambda i, j: (i, 0)),   # x row block, full K
                    pl.BlockSpec((tn, Kp), lambda i, j: (j, 0)),   # W (N, K) block, full K
                    pl.BlockSpec((1, tn), lambda i, j: (0, j)),    # bias block
                ],
                out_specs=pl.BlockSpec((tm, tn), lambda i, j: (i, j)),
            ),
            compiler_params=pltpu.CompilerParams(
                dimension_semantics=("parallel", "parallel"),
                vmem_limit_bytes=vmem_limit,
            ),
            cost_estimate=cost,
        )(x_p, w_p, b_p)
    else:
        y_p = pl.pallas_call(
            _linear_kernel_multi_k,
            out_shape=jax.ShapeDtypeStruct((Mp, Np), out_dtype),
            grid_spec=pltpu.PrefetchScalarGridSpec(
                num_scalar_prefetch=0,
                grid=(num_m, num_n, num_k),
                in_specs=[
                    pl.BlockSpec((tm, tk), lambda i, j, k: (i, k)),   # x row/K tile
                    pl.BlockSpec((tn, tk), lambda i, j, k: (j, k)),   # W (N, K) tile
                    pl.BlockSpec((1, tn), lambda i, j, k: (0, j)),    # bias tile
                ],
                out_specs=pl.BlockSpec((tm, tn), lambda i, j, k: (i, j)),
                scratch_shapes=[pltpu.VMEM((tm, tn), jnp.float32)],
            ),
            compiler_params=pltpu.CompilerParams(
                # M / N shard across TensorCores (v7x); K is the sequential reduction.
                dimension_semantics=("parallel", "parallel", "arbitrary"),
                vmem_limit_bytes=vmem_limit,
            ),
            cost_estimate=cost,
        )(x_p, w_p, b_p)

    y = y_p if (Mp == M and Np == N) else y_p[:M, :N]
    return y.reshape(lead_shape + (N,))


if __name__ == "__main__":
    # Small shapes consistent with an adapter wrapping nn.Linear(hidden, hidden):
    batch, seq, hidden, out_features = 2, 8, 32, 32

    key = jax.random.PRNGKey(0)
    kx, kw, kb = jax.random.split(key, 3)

    x = jax.random.normal(kx, (batch, seq, hidden), dtype=jnp.float32)
    # nn.Linear-shaped parameters: (out_features, in_features) / (out_features,)
    weight = jax.random.normal(kw, (out_features, hidden), dtype=jnp.float32) * 0.02
    bias = jax.random.normal(kb, (out_features,), dtype=jnp.float32) * 0.02

    y_ref = x @ weight.T + bias

    # 1) exact-precision path (f32 operands, f32 accumulation) — tight tolerance check
    y32 = base_adapter_forward(x, weight, bias, compute_dtype=jnp.float32)
    y32 = jax.block_until_ready(y32)
    assert y32.shape == (batch, seq, out_features)
    assert jnp.allclose(y32, y_ref, atol=1e-5, rtol=1e-5)

    # 2) production path: frozen weight pre-cast once to bf16, f32 accumulation in-kernel
    w_bf16, b_f32 = prepare_base_linear_params(weight, bias)
    y16 = base_adapter_forward(x, w_bf16, b_f32)
    y16 = jax.block_until_ready(y16)
    assert y16.shape == (batch, seq, out_features)
    assert jnp.allclose(y16, y_ref, atol=1e-2, rtol=1e-2)

    print("KERNEL_OK")
</pallas_src>

<mosaic_0001>
module attributes {stable_mosaic.version = 11 : i64} {
  func.func @_linear_kernel_single_k(%arg0: i32, %arg1: i32, %arg2: memref<16x128xf32, #tpu.memory_space<vmem>>, %arg3: memref<128x128xf32, #tpu.memory_space<vmem>>, %arg4: memref<1x128xf32, #tpu.memory_space<vmem>>, %arg5: memref<16x128xf32, #tpu.memory_space<vmem>>) attributes {dimension_semantics = [#tpu.dimension_semantics<parallel>, #tpu.dimension_semantics<parallel>], iteration_bounds = array<i64: 1, 1>, scalar_prefetch = 0 : i64, scratch_operands = 0 : i64, tpu.core_type = #tpu.core_type<tc>, window_params = [{transform_indices = @transform_0, window_bounds = array<i64: 16, 128>}, {transform_indices = @transform_1, window_bounds = array<i64: 128, 128>}, {transform_indices = @transform_2, window_bounds = array<i64: 1, 128>}, {transform_indices = @transform_3, window_bounds = array<i64: 16, 128>}]} {
    %c0 = arith.constant 0 : index
    %c0_0 = arith.constant 0 : index
    %0 = vector.load %arg2[%c0, %c0_0] : memref<16x128xf32, #tpu.memory_space<vmem>>, vector<16x128xf32>
    %c0_1 = arith.constant 0 : index
    %c0_2 = arith.constant 0 : index
    %1 = vector.load %arg3[%c0_1, %c0_2] : memref<128x128xf32, #tpu.memory_space<vmem>>, vector<128x128xf32>
    %cst = arith.constant dense<0.000000e+00> : vector<16x128xf32>
    %2 = tpu.matmul %0, %1, %cst {dimension_numbers = #tpu.dot_dimension_numbers<[1], [1], [0], [0], [0, 0, 1, 0], [], []>} : vector<16x128xf32>, vector<128x128xf32>, vector<16x128xf32> -> vector<16x128xf32>
    %c0_3 = arith.constant 0 : index
    %c0_4 = arith.constant 0 : index
    %3 = vector.load %arg4[%c0_3, %c0_4] : memref<1x128xf32, #tpu.memory_space<vmem>>, vector<1x128xf32>
    %4 = vector.broadcast %3 : vector<1x128xf32> to vector<16x128xf32>
    %5 = arith.addf %2, %4 : vector<16x128xf32>
    %c0_5 = arith.constant 0 : index
    %c0_6 = arith.constant 0 : index
    %6 = vector.load %arg5[%c0_5, %c0_6] : memref<16x128xf32, #tpu.memory_space<vmem>>, vector<16x128xf32>
    tpu.vector_store %arg5[%c0_5, %c0_6], %5 {strides = array<i32>} : memref<16x128xf32, #tpu.memory_space<vmem>>, vector<16x128xf32>,
    return
  }
  func.func @transform_0(%arg0: i32, %arg1: i32) -> (i32, i32) {
    %c0_i32 = arith.constant 0 : i32
    %c0_i32_0 = arith.constant 0 : i32
    return %arg0, %c0_i32 : i32, i32
  }
  func.func @transform_1(%arg0: i32, %arg1: i32) -> (i32, i32) {
    %c0_i32 = arith.constant 0 : i32
    %c0_i32_0 = arith.constant 0 : i32
    return %arg1, %c0_i32 : i32, i32
  }
  func.func @transform_2(%arg0: i32, %arg1: i32) -> (i32, i32) {
    %c0_i32 = arith.constant 0 : i32
    %c0_i32_0 = arith.constant 0 : i32
    return %c0_i32, %arg1 : i32, i32
  }
  func.func @transform_3(%arg0: i32, %arg1: i32) -> (i32, i32) {
    %c0_i32 = arith.constant 0 : i32
    return %arg0, %arg1 : i32, i32
  }
}

</mosaic_0001>

<bundles_post_ra>
// kernel: tpu_custom_call.1
= control target key start
LH: loop header
LB: loop body
LE: loop exit
PB: predicated region body
PF: predicated region fallthrough
CT: control target
= control target key end

     0   :  { %8 = vsyncpa [#allocation3], 0  ;;  %s260_s0 = inlined_call_operand.hbm [shape: f32[16,128], index: 0, kind: input, shape index: {}]   ;;  %s261_s1 = inlined_call_operand.hbm [shape: f32[128,128], index: 1, kind: input, shape index: {}]   ;;  %s262_s2 = inlined_call_operand.vmem [shape: f32[1,128], index: 2, kind: input, shape index: {}]   ;;  %s263_s3 = inlined_call_operand.hbm [shape: f32[16,128], index: 3, kind: output, shape index: {}]  }
   0x1   :  { %9 = vsyncpa [#allocation6], 0 }
   0x2   :  { %10 = vsyncpa [#allocation4], 0  ;;  %s15_s14 = sshll.u32 %s260_s0, 4  ;;  %s214_s15 = smov [#allocation2]   ;;  %s16_s14 = int_to_ptr.hbm [resolvable:$true] %s15_s14 }
   0x3   :  { %s17_s16 = sshll.u32 %s214_s15, 4  ;;  %s28_s19 = sshll.u32 %s261_s1, 4  ;;  %s18_s16 = int_to_ptr.vmem [resolvable:$true] %s17_s16  ;;  %s29_s19 = int_to_ptr.hbm [resolvable:$true] %s28_s19 }
   0x4   :  { %s215_s20 = smov 128   ;;  %s216_s21 = smov 8  }
   0x5   :  { %23 = dma.hbm_to_vmem [thread:$0]  %s16_s14, 256, %s18_s16, [#allocation3], %s215_s20, %s215_s20, %s216_s21  }
   0x6   :  { %s217_s22 = smov [#allocation5]  }
   0x7   :  { %s30_s23 = sshll.u32 %s217_s22, 4  ;;  %s31_s23 = int_to_ptr.vmem [resolvable:$true] %s30_s23 }
   0x8   :  { %36 = dma.hbm_to_vmem [thread:$0]  %s29_s19, 2048, %s31_s23, [#allocation6], %s215_s20, %s215_s20, %s216_s21  }
   0x9   :  { %208 = dma.done.wait [#allocation3], 256  }
   0xa   :  { %209 = vsyncadd [#allocation3], 4294967040 }
   0xb   :  { %210 = dma.done.wait [#allocation6], 2048  }
   0xc   :  { %211 = vsyncadd [#allocation6], 4294965248  ;;  %v64_v0 = vld [vmem:[#allocation5 + $0x78] sm:$0xff]  ;;  %v63_v1 = vld [vmem:[#allocation5 + $0x70] sm:$0xff]  ;;  %s218_s24 = smov [#allocation7]   ;;  %s100_s28 = sshll.u32 %s263_s3, 4  ;;  %s101_s28 = int_to_ptr.hbm [resolvable:$true] %s100_s28 }
   0xd   :  { %69 = vmatpush.xpose.msra.mxu0 %v64_v0  ;;  %114 = vmatpush.xpose.msra.mxu1 %v64_v0  ;;  %v62_v2 = vld [vmem:[#allocation5 + $0x68] sm:$0xff]  ;;  %v61_v3 = vld [vmem:[#allocation5 + $0x60] sm:$0xff]  ;;  %v60_v4 = vld [vmem:[#allocation5 + $0x58] sm:$0xff]  ;;  %s98_s25 = sshll.u32 %s218_s24, 4  ;;  %s99_s25 = int_to_ptr.vmem [resolvable:$true] %s98_s25 }
   0xe   :  { %v59_v5 = vld [vmem:[#allocation5 + $0x50] sm:$0xff]  ;;  %v58_v6 = vld [vmem:[#allocation5 + $0x48] sm:$0xff]  ;;  %v57_v7 = vld [vmem:[#allocation5 + $0x40] sm:$0xff] }
   0xf   :  { %v56_v8 = vld [vmem:[#allocation5 + $0x38] sm:$0xff]  ;;  %v55_v9 = vld [vmem:[#allocation5 + $0x30] sm:$0xff]  ;;  %v54_v10 = vld [vmem:[#allocation5 + $0x28] sm:$0xff] }
  0x10   :  { %v53_v11 = vld [vmem:[#allocation5 + $0x20] sm:$0xff]  ;;  %v52_v12 = vld [vmem:[#allocation5 + $0x18] sm:$0xff]  ;;  %v51_v13 = vld [vmem:[#allocation5 + $0x10] sm:$0xff] }
  0x11   :  { %70 = vmatpush.xpose.msra.mxu0 %v63_v1  ;;  %115 = vmatpush.xpose.msra.mxu1 %v63_v1  ;;  %v50_v14 = vld [vmem:[#allocation5 + $0x8] sm:$0xff]  ;;  %v49_v15 = vld [vmem:[#allocation5] sm:$0xff]  ;;  %v47_v16 = vld [vmem:[#allocation2] sm:$0xff] }
  0x12   :  { %v48_v17 = vld [vmem:[#allocation2 + $0x8] sm:$0xff]  ;;  %v135_v18 = vld [vmem:[%s262_s2] ss:$0 sm:$0xff] }
  0x15   :  { %71 = vmatpush.xpose.msra.mxu0 %v62_v2  ;;  %116 = vmatpush.xpose.msra.mxu1 %v62_v2 }
  0x19   :  { %72 = vmatpush.xpose.msra.mxu0 %v61_v3  ;;  %117 = vmatpush.xpose.msra.mxu1 %v61_v3 }
  0x1d   :  { %73 = vmatpush.xpose.msra.mxu0 %v60_v4  ;;  %118 = vmatpush.xpose.msra.mxu1 %v60_v4 }
  0x21   :  { %74 = vmatpush.xpose.msra.mxu0 %v59_v5  ;;  %119 = vmatpush.xpose.msra.mxu1 %v59_v5 }
  0x25   :  { %75 = vmatpush.xpose.msra.mxu0 %v58_v6  ;;  %120 = vmatpush.xpose.msra.mxu1 %v58_v6 }
  0x29   :  { %76 = vmatpush.xpose.msra.mxu0 %v57_v7  ;;  %121 = vmatpush.xpose.msra.mxu1 %v57_v7 }
  0x2d   :  { %77 = vmatpush.xpose.msra.mxu0 %v56_v8  ;;  %122 = vmatpush.xpose.msra.mxu1 %v56_v8 }
  0x31   :  { %78 = vmatpush.xpose.msra.mxu0 %v55_v9  ;;  %123 = vmatpush.xpose.msra.mxu1 %v55_v9 }
  0x35   :  { %79 = vmatpush.xpose.msra.mxu0 %v54_v10  ;;  %124 = vmatpush.xpose.msra.mxu1 %v54_v10 }
  0x39   :  { %80 = vmatpush.xpose.msra.mxu0 %v53_v11  ;;  %125 = vmatpush.xpose.msra.mxu1 %v53_v11 }
  0x3d   :  { %81 = vmatpush.xpose.msra.mxu0 %v52_v12  ;;  %126 = vmatpush.xpose.msra.mxu1 %v52_v12 }
  0x41   :  { %82 = vmatpush.xpose.msra.mxu0 %v51_v13  ;;  %127 = vmatpush.xpose.msra.mxu1 %v51_v13 }
  0x45   :  { %83 = vmatpush.xpose.msra.mxu0 %v50_v14  ;;  %128 = vmatpush.xpose.msra.mxu1 %v50_v14 }
  0x49   :  { %84 = vmatpush.xpose.msra.mxu0 %v49_v15  ;;  %129 = vmatpush.xpose.msra.mxu1 %v49_v15 }
  0x4c   :  { %85 = vmatmul.f32.vlgmr.msra.gmra.mxu0 %v47_v16  ;;  %88 = vmatmul.f32.vlgmr.msra.gmra.mxu1 %v48_v17 }
  0xc9   :  { %v86_v19 = vpop.f32.mrf.mxu0  ;;  %v89_v20 = vpop.f32.mrf.mxu1 }
  0xca   :  { %v87_v21 = vadd.f32 %v135_v18, %v86_v19  ;;  %v90_v22 = vadd.f32 %v135_v18, %v89_v20 }
  0xcc   :  { %92 = vst [vmem:[#allocation7] sm:$0xff] %v87_v21 }
  0xcd   :  { %93 = vst [vmem:[#allocation7 + $0x8] sm:$0xff] %v90_v22 }
  0xce   :  { %106 = dma.vmem_to_hbm [thread:$0]  %s99_s25, 256, %s101_s28, [#allocation4], %s215_s20, %s215_s20, %s216_s21  }
  0xcf   :  { %212 = dma.done.wait [#allocation4], 256  }
  0xd0   :  { %213 = vsyncadd [#allocation4], 4294967040 }
  0xd1   :  { %111 = vsyncpa [#allocation3], 1 }
  0xd2   :  { %112 = vsyncpa [#allocation6], 1 }
  0xd3   :  { %113 = vsyncpa [#allocation4], 1 }

</bundles_post_ra>
